<compile_context>
chip_gen: v6e
topology: v6e:2x2x1
jax: 0.10.0
libtpu: 0.0.40
codegen_flags: <defaults>
</compile_context>

<pallas_src>
import functools

import jax
import jax.numpy as jnp
from jax.experimental import pallas as pl
from jax.experimental.pallas import tpu as pltpu


def _round_up(v, m):
    return ((v + m - 1) // m) * m


# ----------------------------- kernels -------------------------------------


def _linear_resident_kernel(x_ref, w_ref, b_ref, o_ref):
    """W and bias are full, VMEM-resident blocks (constant index map); 1-D grid over M."""
    o_ref[...] = (
        jnp.dot(x_ref[...], w_ref[...], preferred_element_type=jnp.float32)
        + b_ref[...]
    ).astype(o_ref.dtype)


def _linear_tiled_kernel(x_ref, w_ref, b_ref, o_ref, acc_ref):
    """One (tm, tn) output tile; K reduction runs on grid axis 2 (last, 'arbitrary')."""
    k = pl.program_id(2)
    partial = jnp.dot(x_ref[...], w_ref[...], preferred_element_type=jnp.float32)

    @pl.when(k == 0)
    def _init():
        # Direct assign instead of zero-init + accumulate: saves one full acc-tile
        # store + reload per output tile (store slot pressure, matters on v5e).
        acc_ref[...] = partial

    @pl.when(k > 0)
    def _accum():
        acc_ref[...] += partial

    @pl.when(k == pl.num_programs(2) - 1)
    def _finalize():
        # Bias added exactly once per output tile.
        o_ref[...] = (acc_ref[...] + b_ref[...]).astype(o_ref.dtype)


# ----------------------------- pallas_call wrappers -------------------------


_VMEM_LIMIT = 48 * 1024 * 1024


@functools.partial(jax.jit, static_argnames=("tm",))
def _linear_resident(xb, wp, bp, *, tm):
    """xb: (Bp, Kp) bf16, wp: (Kp, Np) bf16, bp: (1, Np) f32. Bp mult of 8; Kp/Np mult of 128."""
    Bp, Kp = xb.shape
    Np = wp.shape[1]
    gm = pl.cdiv(Bp, tm)

    cost = pl.CostEstimate(
        flops=2 * Bp * Kp * Np,
        transcendentals=0,
        bytes_accessed=(
            xb.size * xb.dtype.itemsize       # x read once
            + wp.size * wp.dtype.itemsize     # weight read exactly once (resident)
            + bp.size * bp.dtype.itemsize
            + Bp * Np * 4                     # f32 output
        ),
    )

    return pl.pallas_call(
        _linear_resident_kernel,
        out_shape=jax.ShapeDtypeStruct((Bp, Np), jnp.float32),
        grid_spec=pltpu.PrefetchScalarGridSpec(
            num_scalar_prefetch=0,
            grid=(gm,),
            in_specs=[
                pl.BlockSpec((tm, Kp), lambda i: (i, 0)),
                pl.BlockSpec((Kp, Np), lambda i: (0, 0)),  # constant index -> loaded once
                pl.BlockSpec((1, Np), lambda i: (0, 0)),
            ],
            out_specs=pl.BlockSpec((tm, Np), lambda i: (i, 0)),
        ),
        compiler_params=pltpu.CompilerParams(
            dimension_semantics=("parallel",),
            vmem_limit_bytes=_VMEM_LIMIT,
        ),
        cost_estimate=cost,
    )(xb, wp, bp)


@functools.partial(jax.jit, static_argnames=("tm", "tn", "tk"))
def _linear_tiled(xb, wp, bp, *, tm, tn, tk):
    """General 3-D (M, N, K) tiled path. Kp is a multiple of tk; M/N blocks may be ragged."""
    Bp, Kp = xb.shape
    Np = wp.shape[1]
    gm, gn, gk = pl.cdiv(Bp, tm), pl.cdiv(Np, tn), Kp // tk

    cost = pl.CostEstimate(
        flops=2 * Bp * Kp * Np,
        transcendentals=0,
        bytes_accessed=(
            xb.size * xb.dtype.itemsize * gn   # x re-read once per N block
            + wp.size * wp.dtype.itemsize * gm  # W re-read once per M block
            + bp.size * bp.dtype.itemsize * gm
            + Bp * Np * 4
        ),
    )

    return pl.pallas_call(
        _linear_tiled_kernel,
        out_shape=jax.ShapeDtypeStruct((Bp, Np), jnp.float32),
        grid_spec=pltpu.PrefetchScalarGridSpec(
            num_scalar_prefetch=0,
            grid=(gm, gn, gk),
            in_specs=[
                pl.BlockSpec((tm, tk), lambda i, j, k: (i, k)),
                pl.BlockSpec((tk, tn), lambda i, j, k: (k, j)),
                pl.BlockSpec((1, tn), lambda i, j, k: (0, j)),
            ],
            out_specs=pl.BlockSpec((tm, tn), lambda i, j, k: (i, j)),
            scratch_shapes=[pltpu.VMEM((tm, tn), jnp.float32)],
        ),
        compiler_params=pltpu.CompilerParams(
            dimension_semantics=("parallel", "parallel", "arbitrary"),
            vmem_limit_bytes=_VMEM_LIMIT,
        ),
        cost_estimate=cost,
    )(xb, wp, bp)


# ----------------------------- module wrapper -------------------------------


class LRPallas:
    """JAX/Pallas equivalent of the PyTorch LR module (a single nn.Linear)."""

    def __init__(self, in_size, out_size, key, *, force_pallas=False,
                 force_tiled=False, tm_cap=256, tn_cap=1024, tk_cap=1024):
        self.in_size = in_size
        self.out_size = out_size
        self.force_pallas = force_pallas

        # Deterministic init mimicking PyTorch nn.Linear: U(-1/sqrt(in), 1/sqrt(in)).
        k_w, k_b = jax.random.split(key)
        bound = 1.0 / (in_size ** 0.5)
        # Stored as (in, out) so the kernel computes x @ W directly.
        self.weight = jax.random.uniform(k_w, (in_size, out_size), jnp.float32, -bound, bound)
        self.bias = jax.random.uniform(k_b, (out_size,), jnp.float32, -bound, bound)

        # Static tile sizes. tm is chosen per call from the batch; tn/tk are static.
        kp128 = _round_up(in_size, 128)
        np128 = _round_up(out_size, 128)
        self._tm_cap = tm_cap
        self.tk = min(tk_cap, kp128)
        self.tn = min(tn_cap, np128)
        # K must tile exactly (a ragged K block would read garbage that pollutes valid
        # rows), so pad K up to a multiple of tk; zero rows of W neutralize it.
        self.kp = _round_up(in_size, self.tk)
        # Ragged M / N blocks are safe (garbage lands only in masked-out rows/cols).
        self.np_ = np128

        # Parameters padded ONCE; weight stored in bf16 to halve its DMA bytes.
        self._wp = (
            jnp.zeros((self.kp, self.np_), jnp.float32)
            .at[:in_size, :out_size].set(self.weight)
            .astype(jnp.bfloat16)
        )
        self._bp = jnp.zeros((1, self.np_), jnp.float32).at[0, :out_size].set(self.bias)

        # W-resident path when the padded bf16 weight plus one double-buffered x/out tile
        # fits well inside the v7x 64 MiB VMEM budget (load W from HBM exactly once).
        w_bytes = self.kp * self.np_ * 2
        x_tile_bytes = 2 * tm_cap * self.kp * 2          # bf16, double-buffered
        o_tile_bytes = 2 * tm_cap * self.np_ * 4         # f32, double-buffered
        self._resident = (
            not force_tiled
            and w_bytes <= 8 * 1024 * 1024
            and (w_bytes + x_tile_bytes + o_tile_bytes) <= 40 * 1024 * 1024
        )

    def __call__(self, x):
        x = x.astype(jnp.float32)
        B, K = x.shape
        assert K == self.in_size

        # Tiny-problem fallback: kernel dispatch + padding is pure overhead for a 2x1x1
        # linear. The demo forces the Pallas path so the kernel is actually exercised.
        if not self.force_pallas and B * K * self.out_size < (1 << 18):
            return x @ self.weight + self.bias

        # Pad the batch only to a sublane multiple (8), NOT to a multiple of tm; the
        # ragged last M block is handled by the cdiv grid + masked output writes.
        bp_rows = _round_up(B, 8)
        tm = min(self._tm_cap, bp_rows)

        # Feed the MXU bf16 (cast fuses with the pad); K zero-pad is kept on purpose.
        xb = x.astype(jnp.bfloat16)
        if (bp_rows, self.kp) != (B, K):
            xb = jnp.pad(xb, ((0, bp_rows - B), (0, self.kp - K)))

        if self._resident:
            out = _linear_resident(xb, self._wp, self._bp, tm=tm)
        else:
            out = _linear_tiled(xb, self._wp, self._bp, tm=tm, tn=self.tn, tk=self.tk)
        return out[:B, : self.out_size]


# ----------------------------- demo / self-test ------------------------------


def _check(pred, x, model, tag):
    # Reference with matched bf16 operand precision (f32 accumulation) -> tight check.
    ref_bf16 = (
        jnp.dot(x.astype(jnp.bfloat16), model.weight.astype(jnp.bfloat16),
                preferred_element_type=jnp.float32)
        + model.bias
    )
    assert jnp.allclose(pred, ref_bf16, atol=2e-3, rtol=2e-3), f"{tag}: bf16-ref mismatch"
    # Loose check against the pure-f32 reference (semantic equivalence to nn.Linear).
    ref_f32 = x @ model.weight + model.bias
    assert jnp.allclose(pred, ref_f32, atol=5e-2, rtol=5e-2), f"{tag}: f32-ref mismatch"


if __name__ == "__main__":
    key = jax.random.PRNGKey(0)
    k1, k2, k3, kx2, kx3 = jax.random.split(key, 5)

    # ---- Case 1: exactly the reference spec (in=1, out=1, batch=2), resident path. ----
    model1 = LRPallas(1, 1, k1, force_pallas=True)
    x1 = jnp.array([[1.0], [2.3]], dtype=jnp.float32)  # matches the torch reference input
    pred1 = jax.block_until_ready(model1(x1))
    assert pred1.shape == (2, 1)
    _check(pred1, x1, model1, "case1")

    # ---- Case 2: non-tile-aligned batch (ragged last M block), W-resident path. ----
    model2 = LRPallas(200, 150, k2, force_pallas=True)
    x2 = jax.random.normal(kx2, (300, 200), jnp.float32)
    pred2 = jax.block_until_ready(model2(x2))
    assert pred2.shape == (300, 150)
    _check(pred2, x2, model2, "case2")

    # ---- Case 3: force the tiled (M,N,K) path with small tile caps so the K-axis
    #      accumulator, ragged M and ragged N blocks are all exercised. ----
    model3 = LRPallas(300, 300, k3, force_pallas=True, force_tiled=True,
                      tm_cap=128, tn_cap=256, tk_cap=128)
    x3 = jax.random.normal(kx3, (260, 300), jnp.float32)
    pred3 = jax.block_until_ready(model3(x3))
    assert pred3.shape == (260, 300)
    _check(pred3, x3, model3, "case3")

    print("KERNEL_OK")
</pallas_src>

<mosaic_0001>
module attributes {stable_mosaic.version = 11 : i64} {
  func.func @_linear_resident_kernel(%arg0: i32, %arg1: memref<8x128xbf16, #tpu.memory_space<vmem>>, %arg2: memref<128x128xbf16, #tpu.memory_space<vmem>>, %arg3: memref<1x128xf32, #tpu.memory_space<vmem>>, %arg4: memref<8x128xf32, #tpu.memory_space<vmem>>) attributes {dimension_semantics = [#tpu.dimension_semantics<parallel>], iteration_bounds = array<i64: 1>, scalar_prefetch = 0 : i64, scratch_operands = 0 : i64, tpu.core_type = #tpu.core_type<tc>, window_params = [{transform_indices = @transform_0, window_bounds = array<i64: 8, 128>}, {pipeline_mode = #tpu.pipeline_mode<synchronous>, transform_indices = @transform_1, window_bounds = array<i64: 128, 128>}, {pipeline_mode = #tpu.pipeline_mode<synchronous>, transform_indices = @transform_2, window_bounds = array<i64: 1, 128>}, {transform_indices = @transform_3, window_bounds = array<i64: 8, 128>}]} {
    %c0 = arith.constant 0 : index
    %c0_0 = arith.constant 0 : index
    %0 = vector.load %arg1[%c0, %c0_0] : memref<8x128xbf16, #tpu.memory_space<vmem>>, vector<8x128xbf16>
    %c0_1 = arith.constant 0 : index
    %c0_2 = arith.constant 0 : index
    %1 = vector.load %arg2[%c0_1, %c0_2] : memref<128x128xbf16, #tpu.memory_space<vmem>>, vector<128x128xbf16>
    %cst = arith.constant dense<0.000000e+00> : vector<8x128xf32>
    %2 = tpu.matmul %0, %1, %cst {dimension_numbers = #tpu.dot_dimension_numbers<[1], [0], [0], [1], [0, 0, 1, 1], [], []>} : vector<8x128xbf16>, vector<128x128xbf16>, vector<8x128xf32> -> vector<8x128xf32>
    %c0_3 = arith.constant 0 : index
    %c0_4 = arith.constant 0 : index
    %3 = vector.load %arg3[%c0_3, %c0_4] : memref<1x128xf32, #tpu.memory_space<vmem>>, vector<1x128xf32>
    %4 = vector.broadcast %3 : vector<1x128xf32> to vector<8x128xf32>
    %5 = arith.addf %2, %4 : vector<8x128xf32>
    %c0_5 = arith.constant 0 : index
    %c0_6 = arith.constant 0 : index
    %6 = vector.load %arg4[%c0_5, %c0_6] : memref<8x128xf32, #tpu.memory_space<vmem>>, vector<8x128xf32>
    tpu.vector_store %arg4[%c0_5, %c0_6], %5 {strides = array<i32>} : memref<8x128xf32, #tpu.memory_space<vmem>>, vector<8x128xf32>,
    return
  }
  func.func @transform_0(%arg0: i32) -> (i32, i32) {
    %c0_i32 = arith.constant 0 : i32
    %c0_i32_0 = arith.constant 0 : i32
    return %arg0, %c0_i32 : i32, i32
  }
  func.func @transform_1(%arg0: i32) -> (i32, i32) {
    %c0_i32 = arith.constant 0 : i32
    %c0_i32_0 = arith.constant 0 : i32
    %c0_i32_1 = arith.constant 0 : i32
    return %c0_i32, %c0_i32_0 : i32, i32
  }
  func.func @transform_2(%arg0: i32) -> (i32, i32) {
    %c0_i32 = arith.constant 0 : i32
    %c0_i32_0 = arith.constant 0 : i32
    %c0_i32_1 = arith.constant 0 : i32
    return %c0_i32, %c0_i32_0 : i32, i32
  }
  func.func @transform_3(%arg0: i32) -> (i32, i32) {
    %c0_i32 = arith.constant 0 : i32
    %c0_i32_0 = arith.constant 0 : i32
    return %arg0, %c0_i32 : i32, i32
  }
}

</mosaic_0001>

<bundles_post_ra>
// kernel: _linear_resident.1
= control target key start
LH: loop header
LB: loop body
LE: loop exit
PB: predicated region body
PF: predicated region fallthrough
CT: control target
= control target key end

     0   :  { %8 = vsyncpa [#allocation3], 0  ;;  %s329_s0 = inlined_call_operand.hbm [shape: bf16[8,128], index: 0, kind: input, shape index: {}]   ;;  %s330_s1 = inlined_call_operand.hbm [shape: bf16[128,128], index: 1, kind: input, shape index: {}]   ;;  %s331_s2 = inlined_call_operand.vmem [shape: f32[1,128], index: 2, kind: input, shape index: {}]   ;;  %s332_s3 = inlined_call_operand.hbm [shape: f32[8,128], index: 3, kind: output, shape index: {}]  }
   0x1   :  { %9 = vsyncpa [#allocation6], 0 }
   0x2   :  { %10 = vsyncpa [#allocation4], 0  ;;  %s290_s12 = smov [#allocation2]   ;;  %s291_s14 = smov [#allocation5]  }
   0x3   :  { %s17_s13 = sshll.u32 %s290_s12, 4  ;;  %s26_s15 = sshll.u32 %s291_s14, 4  ;;  %s18_s13 = int_to_ptr.vmem [resolvable:$true] %s17_s13  ;;  %s27_s15 = int_to_ptr.vmem [resolvable:$true] %s26_s15 }
   0x4   :  { %s232_s16 = scalar_lea.vmem %s18_s13, 64  ;;  %p237_p1 = scmp.lt.s32.totalorder %s18_s13, %s18_s13 }
   0x5   :  { %p233_p0 = scmp.ne.s32.totalorder %s18_s13, %s232_s16  ;;  %p238_p2 = scmp.lt.s32.totalorder %s232_s16, %s232_s16 }
   0x7   :  { %p239_p3 = por %p238_p2, %p237_p1 }
   0x9   :  { %p240_p4 = pnand %p239_p3, %p233_p0 }
   0xb   :  { %243 = shalt.err (!%p240_p4)
}
   0xc   :  { %20 = dma.hbm_to_vmem [thread:$0]  %s329_s0, 64, %s18_s13, [#allocation3]  }
   0xd   :  { %s252_s19 = scalar_lea.vmem %s27_s15, 1024  ;;  %p257_p6 = scmp.lt.s32.totalorder %s27_s15, %s27_s15 }
   0xe   :  { %p253_p5 = scmp.ne.s32.totalorder %s27_s15, %s252_s19  ;;  %p258_p7 = scmp.lt.s32.totalorder %s252_s19, %s252_s19 }
  0x10   :  { %p259_p8 = por %p258_p7, %p257_p6 }
  0x12   :  { %p260_p9 = pnand %p259_p8, %p253_p5 }
  0x14   :  { %263 = shalt.err (!%p260_p9)
}
  0x15   :  { %s292_s20 = smov 64   ;;  %s293_s21 = smov 4  }
  0x16   :  { %32 = dma.hbm_to_vmem [thread:$0]  %s330_s1, 1024, %s27_s15, [#allocation6], %s292_s20, %s292_s20, %s293_s21  }
  0x17   :  { %284 = dma.done.wait [#allocation3], 64  }
  0x18   :  { %285 = vsyncadd [#allocation3], 4294967232 }
  0x19   :  { %286 = dma.done.wait [#allocation6], 1024  }
  0x1a   :  { %287 = vsyncadd [#allocation6], 4294966272  ;;  %v294_v0 = vmov 0.0   ;;  %vm295_vm0 = vmmov 0   ;;  %v216_v1 = vld [vmem:[#allocation5 + $0x38] sm:$0xff]   ;;  %v217_v2 = vld [vmem:[#allocation5 + $0x30] sm:$0xff]  }
  0x1b   :  { %189 = vmatprep.subr.bf16.mxu0 %v294_v0  ;;  %205 = vmatprep.mubr.msk.bf16.mxu0 %vm295_vm0, %v294_v0  ;;  %v218_v3 = vld [vmem:[#allocation5 + $0x28] sm:$0xff]   ;;  %v219_v4 = vld [vmem:[#allocation5 + $0x20] sm:$0xff]   ;;  %v220_v5 = vld [vmem:[#allocation5 + $0x18] sm:$0xff]   ;;  %s296_s24 = smov [#allocation7]  }
  0x1c   :  { %190 = vmatpush3.bf16.msra.mxu0 %v216_v1  ;;  %v221_v6 = vld [vmem:[#allocation5 + $0x10] sm:$0xff]   ;;  %v222_v7 = vld [vmem:[#allocation5 + $0x8] sm:$0xff]   ;;  %v223_v8 = vld [vmem:[#allocation5] sm:$0xff]   ;;  %s161_s25 = sshll.u32 %s296_s24, 4  ;;  %s162_s25 = int_to_ptr.vmem [resolvable:$true] %s161_s25 }
  0x1d   :  { %191 = vmatprep.subr.bf16.mxu0 %v294_v0  ;;  %v42_v9 = vld [vmem:[#allocation2] sm:$0xf]  ;;  %s264_s26 = scalar_lea.vmem %s162_s25, 128  ;;  %p269_p11 = scmp.lt.s32.totalorder %s162_s25, %s162_s25 }
  0x1e   :  { %v171_v10 = vld [vmem:[%s331_s2] ss:$0 sm:$0xff]  ;;  %p265_p10 = scmp.ne.s32.totalorder %s162_s25, %s264_s26  ;;  %p270_p12 = scmp.lt.s32.totalorder %s264_s26, %s264_s26 }
  0x20   :  { %192 = vmatpush3.bf16.msra.mxu0 %v217_v2  ;;  %p271_p13 = por %p270_p12, %p269_p11 }
  0x21   :  { %193 = vmatprep.subr.bf16.mxu0 %v294_v0 }
  0x22   :  { %p272_p0 = pnand %p271_p13, %p265_p10 }
  0x24   :  { %194 = vmatpush3.bf16.msra.mxu0 %v218_v3 }
  0x25   :  { %195 = vmatprep.subr.bf16.mxu0 %v294_v0 }
  0x28   :  { %196 = vmatpush3.bf16.msra.mxu0 %v219_v4 }
  0x29   :  { %197 = vmatprep.subr.bf16.mxu0 %v294_v0 }
  0x2c   :  { %198 = vmatpush3.bf16.msra.mxu0 %v220_v5 }
  0x2d   :  { %199 = vmatprep.subr.bf16.mxu0 %v294_v0 }
  0x30   :  { %200 = vmatpush3.bf16.msra.mxu0 %v221_v6 }
  0x31   :  { %201 = vmatprep.subr.bf16.mxu0 %v294_v0 }
  0x34   :  { %202 = vmatpush3.bf16.msra.mxu0 %v222_v7 }
  0x35   :  { %203 = vmatprep.subr.bf16.mxu0 %v294_v0 }
  0x38   :  { %204 = vmatpush3.bf16.msra.mxu0 %v223_v8 }
  0x3b   :  { %206 = vmatmul.mubr.bf16.vlgmr.msra.gmra.mxu0 %v42_v9 }
  0xfb   :  { %v148_v11 = vpop.f32.mrf.mxu0 }
  0xfc   :  { %v149_v12 = vadd.f32 %v171_v10, %v148_v11 }
  0xfd   :  { %v207_v13 = vpop.f32.mrf.mxu0 }
  0xfe   :  { %154 = vst [vmem:[#allocation7] sm:$0xff] %v149_v12 }
  0xff   :  { %v151_v14 = vpop.f32.mrf.mxu0 }
 0x100   :  { %275 = shalt.err (!%p272_p0)
}
 0x101   :  { %164 = dma.vmem_to_hbm [thread:$0]  %s162_s25, 128, %s332_s3, [#allocation4]   ;;  %v208_v15 = vpop.f32.mrf.mxu0 }
 0x102   :  { %288 = dma.done.wait [#allocation4], 128  }
 0x103   :  { %289 = vsyncadd [#allocation4], 4294967168 }
 0x104   :  { %168 = vsyncpa [#allocation3], 1 }
 0x105   :  { %169 = vsyncpa [#allocation6], 1 }
 0x106   :  { %170 = vsyncpa [#allocation4], 1 }

</bundles_post_ra>
